<compile_context>
chip_gen: v7x
topology: tpu7x:2x2x1
jax: 0.10.0
libtpu: 0.0.40
codegen_flags: <defaults>
</compile_context>

<pallas_src>
import functools

import jax
import jax.numpy as jnp
from jax import lax
from jax.experimental import pallas as pl
from jax.experimental.pallas import tpu as pltpu


def _round_up(x, m):
    return ((x + m - 1) // m) * m


def _vmem_budget_bytes():
    """Usable VMEM budget for this device (capacity minus ~15% headroom)."""
    cap = 64 * 1024 * 1024                       # conservative fallback (v7x)
    try:
        info = pltpu.get_tpu_info()
        cap = int(getattr(info, "vmem_capacity_bytes", cap)) or cap
    except Exception:
        pass
    return min(int(cap * 0.85), 112 * 1024 * 1024)


def _plan_tiling(n, cp, abytes, budget):
    """Pick (Np, tm, tn): Np = padded node count (multiple of 128, possibly a
    little larger when that enables much larger tiles); tm/tn are divisors of
    Np (multiples of 128), sized so the double-buffered A tile plus the
    resident f32 scratch (xbuf + acc + part + output blocks) fits the budget.
    Cost model: one hop of A bytes + per-grid-step overhead (~0.35us ~ 350KB)."""
    base = _round_up(max(n, 1), 128)
    best = None
    for extra in range(8):
        np_ = base + 128 * extra
        resident = (3 * np_ * cp + 2 * 1024 * cp + 1024 * cp) * 4
        tile_budget = budget - resident - (4 << 20)
        if tile_budget <= 0:
            tile_budget = 2 << 20            # degrade; compiler may still fit
        tm_cap, tn_cap = 1024, 2048
        while 2 * tm_cap * tn_cap * abytes > tile_budget and (
                tm_cap > 128 or tn_cap > 128):
            if tn_cap >= 2 * tm_cap or tm_cap == 128:
                tn_cap //= 2
            else:
                tm_cap //= 2
        tn = max(t for t in range(128, min(tn_cap, np_) + 1, 128)
                 if np_ % t == 0)
        tm = max(t for t in range(128, min(tm_cap, np_) + 1, 128)
                 if np_ % t == 0)
        steps = (np_ // tm) * (np_ // tn)
        cost = np_ * np_ * abytes + steps * 350_000
        if best is None or cost < best[0]:
            best = (cost, np_, tm, tn)
    return best[1], best[2], best[3]


def _proj_row_tile(np_, fp, cp, budget):
    """Row tile for the projection kernel (must divide Np, fit the budget)."""
    for t in (1024, 512, 256, 128):
        if np_ % t == 0 and 4 * (2 * t * (fp + cp) + fp * cp) <= budget // 2:
            return t
    return 128


# --------------------------------------------------------------------------- #
# Kernel 1: projection  X' = X @ W^T  (f32 MXU matmul, f32 output)
# --------------------------------------------------------------------------- #
def _proj_kernel(x_ref, wt_ref, o_ref):
    o_ref[...] = jnp.dot(x_ref[...], wt_ref[...],
                         preferred_element_type=jnp.float32).astype(o_ref.dtype)


# --------------------------------------------------------------------------- #
# Kernel 2: K propagation hops + weighted accumulation + bias, tiled over A_hat
#   grid = (K, row_blocks, col_blocks)   (k outermost, j = reduction, innermost)
# --------------------------------------------------------------------------- #
def _ssgc_prop_kernel(a_ref, xp_hbm, b_ref, o_ref, xbuf, part, acc, sem,
                      *, K, alpha, n_pad, tm, tn):
    k = pl.program_id(0)           # hop index (sequential)
    i = pl.program_id(1)           # output row block
    j = pl.program_id(2)           # reduction over A_hat column blocks
    nj = pl.num_programs(2)

    coef = (1.0 - alpha) / K
    row = pl.multiple_of(i * tm, tm)

    # One-time (very first grid step): DMA X' (f32, HBM) into ping-pong slot 0.
    @pl.when(jnp.logical_and(k == 0, jnp.logical_and(i == 0, j == 0)))
    def _():
        cp = pltpu.make_async_copy(xp_hbm, xbuf.at[pl.ds(0, n_pad), :],
                                   sem.at[0])
        cp.start()
        cp.wait()

    # Once per row block (first hop): acc = alpha * X' + bias   (all f32)
    @pl.when(jnp.logical_and(k == 0, j == 0))
    def _():
        acc[pl.ds(row, tm), :] = alpha * xbuf[pl.ds(row, tm), :] + b_ref[...]

    # Fresh f32 partial for X_{k+1}[i] at the start of every j sweep.
    @pl.when(j == 0)
    def _():
        part[...] = jnp.zeros_like(part)

    # partial[i] += A[i, j] @ X_k[j]   — identical for every hop.
    # (bf16 x bf16 MXU inputs, f32 accumulation; X_k kept in f32 in VMEM.)
    src = pl.multiple_of(lax.rem(k, 2) * n_pad + j * tn, tn)
    part[...] += jnp.dot(a_ref[...],
                         xbuf[pl.ds(src, tn), :].astype(a_ref.dtype),
                         preferred_element_type=jnp.float32)

    # End of the j sweep: finish X_{k+1}[i], update acc, emit on the last hop.
    @pl.when(j == nj - 1)
    def _():
        xk1 = part[...]                                   # f32 (tm, Cp)
        acc[pl.ds(row, tm), :] += coef * xk1

        @pl.when(k < K - 1)                               # needed by next hop
        def _():
            dst = pl.multiple_of(lax.rem(k + 1, 2) * n_pad + row, tm)
            xbuf[pl.ds(dst, tm), :] = xk1

        # Single lane-dense store per row block. The output index map keeps the
        # block index frozen at (0,0) for k < K-1 (no writeback while the index
        # is unchanged), so the only HBM writeback per block carries valid data.
        @pl.when(k == K - 1)
        def _():
            o_ref[...] = acc[pl.ds(row, tm), :].astype(o_ref.dtype)


# --------------------------------------------------------------------------- #
# Plain-JAX glue: dense normalized adjacency  D^{-1/2} (A + I) D^{-1/2}
# --------------------------------------------------------------------------- #
def gcn_norm_dense(edge_index, num_nodes, edge_weight=None, dtype=jnp.float32):
    src, dst = edge_index[0], edge_index[1]
    if edge_weight is None:
        edge_weight = jnp.ones(src.shape[0], dtype=dtype)
    A = jnp.zeros((num_nodes, num_nodes), dtype=dtype)
    A = A.at[dst, src].add(edge_weight.astype(dtype))     # message flows src -> dst
    A = A + jnp.eye(num_nodes, dtype=dtype)               # self loops
    deg = A.sum(axis=1)
    dinv = jnp.where(deg > 0, lax.rsqrt(deg), 0.0)
    return dinv[:, None] * A * dinv[None, :]


def ssgc_forward(x, edge_index, weight, bias, *, K=5, alpha=0.1,
                 edge_weight=None, use_bf16=True):
    if K < 1:
        raise ValueError("SSGC requires K >= 1")
    N, F = x.shape
    C = weight.shape[0]
    f32 = jnp.float32
    adt = jnp.bfloat16 if use_bf16 else f32        # A_hat streaming dtype
    abytes = jnp.dtype(adt).itemsize

    a_hat = gcn_norm_dense(edge_index, N, edge_weight, f32)

    Fp = _round_up(F, 128)
    Cp = _round_up(C, 128)
    budget = _vmem_budget_bytes()
    Np, tm, tn = _plan_tiling(N, Cp, abytes, budget)

    a_pad = jnp.zeros((Np, Np), f32).at[:N, :N].set(a_hat).astype(adt)
    x_pad = jnp.zeros((Np, Fp), f32).at[:N, :F].set(x.astype(f32))
    wt_pad = jnp.zeros((Fp, Cp), f32).at[:F, :C].set(weight.T.astype(f32))
    b_pad = jnp.zeros((1, Cp), f32).at[0, :C].set(bias.astype(f32))

    # ---- kernel 1: project first (cheaper whenever C < F, the typical case) ----
    # TODO(synk): when C > F it is cheaper to propagate first and project last.
    ptm = _proj_row_tile(Np, Fp, Cp, budget)
    xp = pl.pallas_call(
        _proj_kernel,
        out_shape=jax.ShapeDtypeStruct((Np, Cp), f32),
        grid=(Np // ptm,),
        in_specs=[pl.BlockSpec((ptm, Fp), lambda i: (i, 0)),
                  pl.BlockSpec((Fp, Cp), lambda i: (0, 0))],
        out_specs=pl.BlockSpec((ptm, Cp), lambda i: (i, 0)),
        compiler_params=pltpu.CompilerParams(
            dimension_semantics=("parallel",),
            vmem_limit_bytes=budget),
    )(x_pad, wt_pad)

    # ---- kernel 2: K propagation hops, tiled over A_hat ----
    n_i, n_j = Np // tm, Np // tn
    kernel = functools.partial(_ssgc_prop_kernel, K=K, alpha=float(alpha),
                               n_pad=Np, tm=tm, tn=tn)
    # Freeze the output block index at (0,0) while k < K-1 so each output block
    # is visited in exactly one contiguous run and written back exactly once.
    out_idx = lambda k, i, j: (jnp.where(k == K - 1, i, 0), 0)

    cost = pl.CostEstimate(
        flops=2 * K * Np * Np * Cp,
        transcendentals=0,
        bytes_accessed=K * Np * Np * abytes + 2 * Np * Cp * 4 + Cp * 4,
    )

    out_pad = pl.pallas_call(
        kernel,
        out_shape=jax.ShapeDtypeStruct((Np, Cp), f32),
        grid_spec=pltpu.PrefetchScalarGridSpec(
            num_scalar_prefetch=0,
            grid=(K, n_i, n_j),
            in_specs=[
                pl.BlockSpec((tm, tn), lambda k, i, j: (i, j)),   # A_hat tile
                pl.BlockSpec(memory_space=pl.ANY),                # X' (one DMA)
                pl.BlockSpec((1, Cp), lambda k, i, j: (0, 0)),    # bias
            ],
            out_specs=pl.BlockSpec((tm, Cp), out_idx),
            scratch_shapes=[
                pltpu.VMEM((2 * Np, Cp), jnp.float32),  # X_k ping-pong (VMEM only)
                pltpu.VMEM((tm, Cp), jnp.float32),      # f32 hop partial (row blk)
                pltpu.VMEM((Np, Cp), jnp.float32),      # f32 weighted accumulator
                pltpu.SemaphoreType.DMA((1,)),          # X' copy-in semaphore
            ],
        ),
        compiler_params=pltpu.CompilerParams(
            # Row axis must stay "arbitrary": xbuf / acc scratch is shared across
            # row blocks and hops, so per-core sharding (v7x 2 TCs) would be wrong.
            dimension_semantics=("arbitrary", "arbitrary", "arbitrary"),
            vmem_limit_bytes=budget,
        ),
        cost_estimate=cost,
    )(a_pad, xp, b_pad)

    return out_pad[:N, :C]


def ssgc_reference(x, edge_index, weight, bias, *, K=5, alpha=0.1):
    a_hat = gcn_norm_dense(edge_index, x.shape[0], None, jnp.float32)
    acc = alpha * x
    xk = x
    for _ in range(K):
        xk = a_hat @ xk
        acc = acc + (1.0 - alpha) / K * xk
    return acc @ weight.T + bias[None, :]


if __name__ == "__main__":
    N, F, C, E = 64, 32, 16, 256   # nodes, in_channels, out_channels, edges
    K, alpha = 5, 0.1

    key = jax.random.PRNGKey(0)
    kx, ke, kw, kb = jax.random.split(key, 4)

    x = jax.random.normal(kx, (N, F), dtype=jnp.float32)
    edge_index = jax.random.randint(ke, (2, E), 0, N, dtype=jnp.int32)

    bound = 1.0 / (F ** 0.5)                      # nn.Linear-style init bounds
    weight = jax.random.uniform(kw, (C, F), minval=-bound, maxval=bound,
                                dtype=jnp.float32)
    bias = jax.random.uniform(kb, (C,), minval=-bound, maxval=bound,
                              dtype=jnp.float32)

    ref = ssgc_reference(x, edge_index, weight, bias, K=K, alpha=alpha)

    # f32 path: tight check against the pure-JAX reference.
    out_f32 = jax.block_until_ready(
        ssgc_forward(x, edge_index, weight, bias, K=K, alpha=alpha,
                     use_bf16=False))
    assert out_f32.shape == (N, C)
    assert jnp.allclose(out_f32, ref, atol=1e-4, rtol=1e-4), "f32 mismatch"

    # bf16-A streaming path (default, fast): f32 X_k / accumulation.
    out_bf16 = jax.block_until_ready(
        ssgc_forward(x, edge_index, weight, bias, K=K, alpha=alpha,
                     use_bf16=True))
    assert out_bf16.shape == (N, C)
    assert jnp.allclose(out_bf16, ref, atol=5e-2, rtol=5e-2), "bf16 mismatch"

    print("KERNEL_OK")
</pallas_src>

<mosaic_0001>
module attributes {stable_mosaic.version = 11 : i64} {
  func.func @_proj_kernel(%arg0: i32, %arg1: memref<128x128xf32, #tpu.memory_space<vmem>>, %arg2: memref<128x128xf32, #tpu.memory_space<vmem>>, %arg3: memref<128x128xf32, #tpu.memory_space<vmem>>) attributes {dimension_semantics = [#tpu.dimension_semantics<parallel>], iteration_bounds = array<i64: 1>, scalar_prefetch = 0 : i64, scratch_operands = 0 : i64, tpu.core_type = #tpu.core_type<tc>, window_params = [{transform_indices = @transform_0, window_bounds = array<i64: 128, 128>}, {pipeline_mode = #tpu.pipeline_mode<synchronous>, transform_indices = @transform_1, window_bounds = array<i64: 128, 128>}, {transform_indices = @transform_2, window_bounds = array<i64: 128, 128>}]} {
    %c0 = arith.constant 0 : index
    %c0_0 = arith.constant 0 : index
    %0 = vector.load %arg1[%c0, %c0_0] : memref<128x128xf32, #tpu.memory_space<vmem>>, vector<128x128xf32>
    %c0_1 = arith.constant 0 : index
    %c0_2 = arith.constant 0 : index
    %1 = vector.load %arg2[%c0_1, %c0_2] : memref<128x128xf32, #tpu.memory_space<vmem>>, vector<128x128xf32>
    %cst = arith.constant dense<0.000000e+00> : vector<128x128xf32>
    %2 = tpu.matmul %0, %1, %cst {dimension_numbers = #tpu.dot_dimension_numbers<[1], [0], [0], [1], [0, 0, 1, 1], [], []>} : vector<128x128xf32>, vector<128x128xf32>, vector<128x128xf32> -> vector<128x128xf32>
    %c0_3 = arith.constant 0 : index
    %c0_4 = arith.constant 0 : index
    %3 = vector.load %arg3[%c0_3, %c0_4] : memref<128x128xf32, #tpu.memory_space<vmem>>, vector<128x128xf32>
    tpu.vector_store %arg3[%c0_3, %c0_4], %2 {strides = array<i32>} : memref<128x128xf32, #tpu.memory_space<vmem>>, vector<128x128xf32>,
    return
  }
  func.func @transform_0(%arg0: i32) -> (i32, i32) {
    %c0_i32 = arith.constant 0 : i32
    %c0_i32_0 = arith.constant 0 : i32
    return %arg0, %c0_i32 : i32, i32
  }
  func.func @transform_1(%arg0: i32) -> (i32, i32) {
    %c0_i32 = arith.constant 0 : i32
    %c0_i32_0 = arith.constant 0 : i32
    %c0_i32_1 = arith.constant 0 : i32
    return %c0_i32, %c0_i32_0 : i32, i32
  }
  func.func @transform_2(%arg0: i32) -> (i32, i32) {
    %c0_i32 = arith.constant 0 : i32
    %c0_i32_0 = arith.constant 0 : i32
    return %arg0, %c0_i32 : i32, i32
  }
}

</mosaic_0001>

<bundles_post_ra>
// kernel: tpu_custom_call.1
= control target key start
LH: loop header
LB: loop body
LE: loop exit
PB: predicated region body
PF: predicated region fallthrough
CT: control target
= control target key end

     0   :  { %7 = vsyncpa [#allocation3], 0  ;;  %s529_s0 = inlined_call_operand.hbm [shape: f32[128,128], index: 0, kind: input, shape index: {}]   ;;  %s530_s1 = inlined_call_operand.hbm [shape: f32[128,128], index: 1, kind: input, shape index: {}]   ;;  %s531_s2 = inlined_call_operand.hbm [shape: f32[128,128], index: 2, kind: output, shape index: {}]  }
   0x1   :  { %8 = vsyncpa [#allocation6], 0 }
   0x2   :  { %9 = vsyncpa [#allocation4], 0  ;;  %s464_s9 = smov [#allocation2]   ;;  %s392_s13 = scalar_lea.hbm %s529_s0, 2048 }
   0x3   :  { %s15_s10 = sshll.u32 %s464_s9, 4  ;;  %p393_p0 = scmp.ne.s32.totalorder %s529_s0, %s392_s13  ;;  %s16_s10 = int_to_ptr.vmem [resolvable:$true] %s15_s10 }
   0x4   :  { %p396_p1 = scmp.lt.u32.totalorder %s392_s13, %s529_s0 }
   0x6   :  { %p398_p2 = pnand %p396_p1, %p393_p0 }
   0x8   :  { %401 = shalt.err (!%p398_p2)
}
   0x9   :  { %s402_s18 = scalar_lea.vmem %s16_s10, 2048  ;;  %p407_p4 = scmp.lt.s32.totalorder %s16_s10, %s16_s10 }
   0xa   :  { %p403_p3 = scmp.ne.s32.totalorder %s16_s10, %s402_s18  ;;  %p408_p5 = scmp.lt.s32.totalorder %s402_s18, %s402_s18 }
   0xc   :  { %p409_p6 = por %p408_p5, %p407_p4 }
   0xe   :  { %p410_p7 = pnand %p409_p6, %p403_p3 }
  0x10   :  { %413 = shalt.err (!%p410_p7)
}
  0x11   :  { %s465_s19 = smov 128   ;;  %s466_s20 = smov 8  }
  0x12   :  { %21 = dma.hbm_to_vmem [thread:$0]  %s529_s0, 2048, %s16_s10, [#allocation3], %s465_s19, %s465_s19, %s466_s20  }
  0x13   :  { %s467_s23 = smov [#allocation5]   ;;  %s414_s27 = scalar_lea.hbm %s530_s1, 2048 }
  0x14   :  { %s27_s24 = sshll.u32 %s467_s23, 4  ;;  %p415_p8 = scmp.ne.s32.totalorder %s530_s1, %s414_s27  ;;  %s28_s24 = int_to_ptr.vmem [resolvable:$true] %s27_s24 }
  0x15   :  { %p418_p9 = scmp.lt.u32.totalorder %s414_s27, %s530_s1 }
  0x17   :  { %p420_p10 = pnand %p418_p9, %p415_p8 }
  0x19   :  { %423 = shalt.err (!%p420_p10)
}
  0x1a   :  { %s424_s4 = scalar_lea.vmem %s28_s24, 2048  ;;  %p429_p12 = scmp.lt.s32.totalorder %s28_s24, %s28_s24 }
  0x1b   :  { %p425_p11 = scmp.ne.s32.totalorder %s28_s24, %s424_s4  ;;  %p430_p13 = scmp.lt.s32.totalorder %s424_s4, %s424_s4 }
  0x1d   :  { %p431_p0 = por %p430_p13, %p429_p12 }
  0x1f   :  { %p432_p1 = pnand %p431_p0, %p425_p11 }
  0x21   :  { %435 = shalt.err (!%p432_p1)
}
  0x22   :  { %33 = dma.hbm_to_vmem [thread:$0]  %s530_s1, 2048, %s28_s24, [#allocation6], %s465_s19, %s465_s19, %s466_s20  }
  0x23   :  { %458 = dma.done.wait [#allocation3], 2048  }
  0x24   :  { %459 = vsyncadd [#allocation3], 4294965248 }
  0x25   :  { %460 = dma.done.wait [#allocation6], 2048  }
  0x26   :  { %461 = vsyncadd [#allocation6], 4294965248  ;;  %v56_v0 = vld [vmem:[#allocation5] sm:$0xff]  ;;  %v57_v1 = vld [vmem:[#allocation5 + $0x8] sm:$0xff]  ;;  %s468_s1 = smov [#allocation7]  }
  0x27   :  { %v58_v2 = vld [vmem:[#allocation5 + $0x10] sm:$0xff]  ;;  %v339_v3 = vpack.c.bf16 %v57_v1, %v56_v0  ;;  %v59_v4 = vld [vmem:[#allocation5 + $0x18] sm:$0xff]  ;;  %v60_v6 = vld [vmem:[#allocation5 + $0x20] sm:$0xff]  ;;  %s238_s6 = sshll.u32 %s468_s1, 4  ;;  %s239_s6 = int_to_ptr.vmem [resolvable:$true] %s238_s6 }
  0x28   :  { %v343_v5 = vpack.c.bf16 %v59_v4, %v58_v2  ;;  %v61_v7 = vld [vmem:[#allocation5 + $0x28] sm:$0xff]  ;;  %v40_v9 = vld [vmem:[#allocation2] sm:$0xff]  ;;  %v62_v11 = vld [vmem:[#allocation5 + $0x30] sm:$0xff]  ;;  %s436_s7 = scalar_lea.vmem %s239_s6, 2048  ;;  %p441_p3 = scmp.lt.s32.totalorder %s239_s6, %s239_s6 }
  0x29   :  { %340 = vmatprep.subr.bf16.mxu0 %v339_v3  ;;  %371 = vmatprep.subr.bf16.mxu1 %v339_v3  ;;  %v347_v8 = vpack.c.bf16 %v61_v7, %v60_v6  ;;  %v48_v10 = vld [vmem:[#allocation2 + $0x40] sm:$0xff]  ;;  %v63_v12 = vld [vmem:[#allocation5 + $0x38] sm:$0xff]  ;;  %v65_v15 = vld [vmem:[#allocation5 + $0x48] sm:$0xff]  ;;  %p437_p2 = scmp.ne.s32.totalorder %s239_s6, %s436_s7  ;;  %p442_p4 = scmp.lt.s32.totalorder %s436_s7, %s436_s7 }
  0x2a   :  { %342 = vmatpush3.bf16.msra.mxu0 %v339_v3  ;;  %379 = vmatpush3.bf16.msra.mxu1 %v339_v3  ;;  %v351_v13 = vpack.c.bf16 %v63_v12, %v62_v11  ;;  %v64_v14 = vld [vmem:[#allocation5 + $0x40] sm:$0xff]  ;;  %v66_v17 = vld [vmem:[#allocation5 + $0x50] sm:$0xff]  ;;  %v67_v18 = vld [vmem:[#allocation5 + $0x58] sm:$0xff] }
  0x2b   :  { %344 = vmatprep.subr.bf16.mxu0 %v343_v5  ;;  %372 = vmatprep.subr.bf16.mxu1 %v343_v5  ;;  %v355_v16 = vpack.c.bf16 %v65_v15, %v64_v14  ;;  %v359_v19 = vpack.c.bf16 %v67_v18, %v66_v17  ;;  %v68_v20 = vld [vmem:[#allocation5 + $0x60] sm:$0xff]  ;;  %v69_v21 = vld [vmem:[#allocation5 + $0x68] sm:$0xff]  ;;  %v70_v23 = vld [vmem:[#allocation5 + $0x70] sm:$0xff]  ;;  %p443_p5 = por %p442_p4, %p441_p3 }
  0x2c   :  { %315 = vmatprep.mubr.f32.mxu0 %v40_v9  ;;  %327 = vmatprep.mubr.f32.mxu1 %v48_v10  ;;  %v363_v22 = vpack.c.bf16 %v69_v21, %v68_v20  ;;  %v71_v24 = vld [vmem:[#allocation5 + $0x78] sm:$0xff]  ;;  %v41_v26 = vld [vmem:[#allocation2 + $0x8] sm:$0xff]  ;;  %v42_v28 = vld [vmem:[#allocation2 + $0x10] sm:$0xff] }
  0x2d   :  { %v367_v25 = vpack.c.bf16 %v71_v24, %v70_v23  ;;  %v49_v27 = vld [vmem:[#allocation2 + $0x48] sm:$0xff]  ;;  %v50_v29 = vld [vmem:[#allocation2 + $0x50] sm:$0xff]  ;;  %v43_v30 = vld [vmem:[#allocation2 + $0x18] sm:$0xff]  ;;  %p444_p6 = pnand %p443_p5, %p437_p2 }
  0x2e   :  { %346 = vmatpush3.bf16.msra.mxu0 %v343_v5  ;;  %380 = vmatpush3.bf16.msra.mxu1 %v343_v5  ;;  %v51_v31 = vld [vmem:[#allocation2 + $0x58] sm:$0xff]  ;;  %v44_v32 = vld [vmem:[#allocation2 + $0x20] sm:$0xff]  ;;  %v45_v34 = vld [vmem:[#allocation2 + $0x28] sm:$0xff] }
  0x2f   :  { %348 = vmatprep.subr.bf16.mxu0 %v347_v8  ;;  %373 = vmatprep.subr.bf16.mxu1 %v347_v8  ;;  %v52_v33 = vld [vmem:[#allocation2 + $0x60] sm:$0xff]  ;;  %v53_v35 = vld [vmem:[#allocation2 + $0x68] sm:$0xff]  ;;  %v46_v36 = vld [vmem:[#allocation2 + $0x30] sm:$0xff] }
  0x30   :  { %v54_v37 = vld [vmem:[#allocation2 + $0x70] sm:$0xff]  ;;  %v47_v38 = vld [vmem:[#allocation2 + $0x38] sm:$0xff] }
  0x31   :  { %v55_v39 = vld [vmem:[#allocation2 + $0x78] sm:$0xff] }
  0x32   :  { %350 = vmatpush3.bf16.msra.mxu0 %v347_v8  ;;  %381 = vmatpush3.bf16.msra.mxu1 %v347_v8 }
  0x33   :  { %352 = vmatprep.subr.bf16.mxu0 %v351_v13  ;;  %374 = vmatprep.subr.bf16.mxu1 %v351_v13 }
  0x36   :  { %354 = vmatpush3.bf16.msra.mxu0 %v351_v13  ;;  %382 = vmatpush3.bf16.msra.mxu1 %v351_v13 }
  0x37   :  { %356 = vmatprep.subr.bf16.mxu0 %v355_v16  ;;  %375 = vmatprep.subr.bf16.mxu1 %v355_v16 }
  0x3a   :  { %358 = vmatpush3.bf16.msra.mxu0 %v355_v16  ;;  %383 = vmatpush3.bf16.msra.mxu1 %v355_v16 }
  0x3b   :  { %360 = vmatprep.subr.bf16.mxu0 %v359_v19  ;;  %376 = vmatprep.subr.bf16.mxu1 %v359_v19 }
  0x3e   :  { %362 = vmatpush3.bf16.msra.mxu0 %v359_v19  ;;  %384 = vmatpush3.bf16.msra.mxu1 %v359_v19 }
  0x3f   :  { %364 = vmatprep.subr.bf16.mxu0 %v363_v22  ;;  %377 = vmatprep.subr.bf16.mxu1 %v363_v22 }
  0x42   :  { %366 = vmatpush3.bf16.msra.mxu0 %v363_v22  ;;  %385 = vmatpush3.bf16.msra.mxu1 %v363_v22 }
  0x43   :  { %368 = vmatprep.subr.bf16.mxu0 %v367_v25  ;;  %378 = vmatprep.subr.bf16.mxu1 %v367_v25 }
  0x46   :  { %370 = vmatpush3.bf16.msra.mxu0 %v367_v25  ;;  %386 = vmatpush3.bf16.msra.mxu1 %v367_v25 }
  0x49   :  { %316 = vmatmul.mubr.f32.vlgmr.msra.gmra.mrb[0].mxu0 %v41_v26  ;;  %328 = vmatmul.mubr.f32.vlgmr.msra.gmra.mrb[0].mxu1 %v49_v27 }
  0x4a   :  { %318 = vmatprep.mubr.f32.mxu0 %v42_v28  ;;  %330 = vmatprep.mubr.f32.mxu1 %v50_v29 }
  0x4d   :  { %319 = vmatmul.mubr.f32.gmra.mrb[2].mxu0 %v43_v30  ;;  %331 = vmatmul.mubr.f32.gmra.mrb[2].mxu1 %v51_v31 }
  0x4e   :  { %321 = vmatprep.mubr.f32.mxu0 %v44_v32  ;;  %333 = vmatprep.mubr.f32.mxu1 %v52_v33 }
  0x51   :  { %322 = vmatmul.mubr.f32.gmra.mrb[4].mxu0 %v45_v34  ;;  %334 = vmatmul.mubr.f32.gmra.mrb[4].mxu1 %v53_v35 }
  0x52   :  { %324 = vmatprep.mubr.f32.mxu0 %v46_v36  ;;  %336 = vmatprep.mubr.f32.mxu1 %v54_v37 }
  0x55   :  { %325 = vmatmul.mubr.f32.gmra.mrb[6].mxu0 %v47_v38  ;;  %337 = vmatmul.mubr.f32.gmra.mrb[6].mxu1 %v55_v39 }
 0x11c   :  { %v317_v40 = vpop.f32.mrb[0].mxu0  ;;  %v329_v41 = vpop.f32.mrb[0].mxu1 }
 0x11d   :  { %218 = vst [vmem:[#allocation7 + $0x8] sm:$0xff] %v317_v40  ;;  %226 = vst [vmem:[#allocation7 + $0x48] sm:$0xff] %v329_v41  ;;  %v138_v42 = vpop.f32.mrb[1].mxu0  ;;  %v178_v43 = vpop.f32.mrb[1].mxu1 }
 0x11e   :  { %217 = vst [vmem:[#allocation7] sm:$0xff] %v138_v42  ;;  %225 = vst [vmem:[#allocation7 + $0x40] sm:$0xff] %v178_v43 }
 0x120   :  { %v320_v44 = vpop.f32.mrb[2].mxu0  ;;  %v332_v45 = vpop.f32.mrb[2].mxu1 }
 0x121   :  { %220 = vst [vmem:[#allocation7 + $0x18] sm:$0xff] %v320_v44  ;;  %228 = vst [vmem:[#allocation7 + $0x58] sm:$0xff] %v332_v45  ;;  %v148_v46 = vpop.f32.mrb[3].mxu0  ;;  %v188_v47 = vpop.f32.mrb[3].mxu1 }
 0x122   :  { %219 = vst [vmem:[#allocation7 + $0x10] sm:$0xff] %v148_v46  ;;  %227 = vst [vmem:[#allocation7 + $0x50] sm:$0xff] %v188_v47 }
 0x124   :  { %v323_v48 = vpop.f32.mrb[4].mxu0  ;;  %v335_v49 = vpop.f32.mrb[4].mxu1 }
 0x125   :  { %222 = vst [vmem:[#allocation7 + $0x28] sm:$0xff] %v323_v48  ;;  %230 = vst [vmem:[#allocation7 + $0x68] sm:$0xff] %v335_v49  ;;  %v158_v50 = vpop.f32.mrb[5].mxu0  ;;  %v198_v51 = vpop.f32.mrb[5].mxu1 }
 0x126   :  { %221 = vst [vmem:[#allocation7 + $0x20] sm:$0xff] %v158_v50  ;;  %229 = vst [vmem:[#allocation7 + $0x60] sm:$0xff] %v198_v51 }
 0x128   :  { %v326_v52 = vpop.f32.mrb[6].mxu0  ;;  %v338_v53 = vpop.f32.mrb[6].mxu1 }
 0x129   :  { %224 = vst [vmem:[#allocation7 + $0x38] sm:$0xff] %v326_v52  ;;  %232 = vst [vmem:[#allocation7 + $0x78] sm:$0xff] %v338_v53  ;;  %v168_v54 = vpop.f32.mrb[7].mxu0  ;;  %v208_v55 = vpop.f32.mrb[7].mxu1 }
 0x12a   :  { %223 = vst [vmem:[#allocation7 + $0x30] sm:$0xff] %v168_v54  ;;  %231 = vst [vmem:[#allocation7 + $0x70] sm:$0xff] %v208_v55 }
 0x12b   :  { %447 = shalt.err (!%p444_p6)
}
 0x12c   :  { %s448_s10 = scalar_lea.hbm %s531_s2, 2048 }
 0x12d   :  { %p449_p7 = scmp.ne.s32.totalorder %s531_s2, %s448_s10  ;;  %p452_p8 = scmp.lt.u32.totalorder %s448_s10, %s531_s2 }
 0x12f   :  { %p454_p9 = pnand %p452_p8, %p449_p7 }
 0x131   :  { %457 = shalt.err (!%p454_p9)
}
 0x132   :  { %244 = dma.vmem_to_hbm [thread:$0]  %s239_s6, 2048, %s531_s2, [#allocation4], %s465_s19, %s465_s19, %s466_s20  }
 0x133   :  { %462 = dma.done.wait [#allocation4], 2048  }
 0x134   :  { %463 = vsyncadd [#allocation4], 4294965248 }
 0x135   :  { %248 = vsyncpa [#allocation3], 1 }
 0x136   :  { %249 = vsyncpa [#allocation6], 1 }
 0x137   :  { %250 = vsyncpa [#allocation4], 1 }

</bundles_post_ra>
